<compile_context>
chip_gen: v7x
topology: tpu7x:2x2x1
jax: 0.10.0
libtpu: 0.0.40
codegen_flags: <defaults>
</compile_context>

<pallas_src>
import math
import functools

import jax
import jax.numpy as jnp
from jax.experimental import pallas as pl
from jax.experimental.pallas import tpu as pltpu


# ----------------------------------------------------------------------------
# Small helpers
# ----------------------------------------------------------------------------

def _round_up(x, m):
    return (x + m - 1) // m * m


def _layer_norm(x, w, b, eps=1e-5):
    # x: (S, D) f32, w/b: (1, D) f32  (PyTorch LayerNorm, eps=1e-5)
    mean = jnp.mean(x, axis=-1, keepdims=True)
    xc = x - mean
    var = jnp.mean(xc * xc, axis=-1, keepdims=True)
    inv = jax.lax.rsqrt(var + eps)
    return xc * inv * w + b


def _full_spec(shape):
    # Whole-array block for a 1-D grid.
    nd = len(shape)
    return pl.BlockSpec(shape, lambda b, _nd=nd: (0,) * _nd)


# ----------------------------------------------------------------------------
# Pallas kernels
# ----------------------------------------------------------------------------

def encoder_layer_kernel(x_ref,
                         wq_ref, wk_ref, wv_ref,          # (H, D, hd) bf16
                         bq_ref, bk_ref, bv_ref,          # (H, 1, hd) f32
                         wo_ref, bo_ref,                  # (H, hd, D) bf16, (1, D) f32
                         ln1w_ref, ln1b_ref,              # (1, D) f32
                         w1_ref, b1_ref,                  # (D, FF) bf16, (1, FF) f32
                         w2_ref, b2_ref,                  # (FF, D) bf16, (1, D) f32
                         ln2w_ref, ln2b_ref,              # (1, D) f32
                         o_ref,                           # (1, S, D) bf16
                         *, nhead):
    # One grid step == one batch element (post-norm PyTorch TransformerEncoderLayer).
    x_bf = x_ref[0]                                   # (S, D) bf16
    x_f32 = x_bf.astype(jnp.float32)
    S, D = x_bf.shape
    hd = D // nhead
    scale = 1.0 / math.sqrt(hd)

    # --- self attention (all heads fused as a leading batch axis) ----------
    xh = jnp.broadcast_to(x_bf[None, :, :], (nhead, S, D))   # (H, S, D) bf16

    q = jnp.einsum('hsd,hde->hse', xh, wq_ref[...],
                   preferred_element_type=jnp.float32) + bq_ref[...]   # (H,S,hd) f32
    k = jnp.einsum('hsd,hde->hse', xh, wk_ref[...],
                   preferred_element_type=jnp.float32) + bk_ref[...]
    v = jnp.einsum('hsd,hde->hse', xh, wv_ref[...],
                   preferred_element_type=jnp.float32) + bv_ref[...]

    # Scores: contraction over head_dim with no explicit transpose.
    s = jnp.einsum('hqe,hke->hqk',
                   q.astype(jnp.bfloat16), k.astype(jnp.bfloat16),
                   preferred_element_type=jnp.float32) * scale          # (H,S,S) f32

    s = s - jnp.max(s, axis=-1, keepdims=True)
    p = jnp.exp(s)
    denom = jnp.sum(p, axis=-1, keepdims=True)
    p = p * pl.reciprocal(denom, approx=True)                           # EUP recip

    o = jnp.einsum('hqk,hke->hqe',
                   p.astype(jnp.bfloat16), v.astype(jnp.bfloat16),
                   preferred_element_type=jnp.float32)                  # (H,S,hd)

    # Output projection, per-head weight slabs, summed over heads (== concat @ Wo).
    proj_h = jnp.einsum('hse,hed->hsd',
                        o.astype(jnp.bfloat16), wo_ref[...],
                        preferred_element_type=jnp.float32)             # (H,S,D)
    proj = jnp.sum(proj_h, axis=0) + bo_ref[...]                        # (S,D) f32

    # residual + norm1 (dropout = identity in eval mode)
    h1 = _layer_norm(x_f32 + proj, ln1w_ref[...], ln1b_ref[...])

    # --- feed forward -------------------------------------------------------
    ff = jnp.dot(h1.astype(jnp.bfloat16), w1_ref[...],
                 preferred_element_type=jnp.float32) + b1_ref[...]
    ff = jnp.maximum(ff, 0.0)                      # ReLU (PyTorch default)
    ff = jnp.dot(ff.astype(jnp.bfloat16), w2_ref[...],
                 preferred_element_type=jnp.float32) + b2_ref[...]

    # residual + norm2
    h2 = _layer_norm(h1 + ff, ln2w_ref[...], ln2b_ref[...])

    o_ref[0] = h2.astype(o_ref.dtype)


def fc_kernel(x_ref, w_ref, b_ref, o_ref):
    # x: (1, S, D) bf16, w: (D, TV) bf16, b: (1, TV) f32 -> o: (1, S, TV) f32
    x = x_ref[0]
    y = jnp.dot(x, w_ref[...], preferred_element_type=jnp.float32) + b_ref[...]
    o_ref[0] = y.astype(o_ref.dtype)


# ----------------------------------------------------------------------------
# Wrappers around pallas_call
# ----------------------------------------------------------------------------

def run_encoder_layer(x, layer_params, nhead):
    """x: (B, S, D) bf16 -> (B, S, D) bf16."""
    B, S, D = x.shape
    weights = list(layer_params)   # 16 tensors, order matches kernel signature

    in_specs = [pl.BlockSpec((1, S, D), lambda b: (b, 0, 0))]
    in_specs += [_full_spec(w.shape) for w in weights]

    return pl.pallas_call(
        functools.partial(encoder_layer_kernel, nhead=nhead),
        out_shape=jax.ShapeDtypeStruct((B, S, D), jnp.bfloat16),
        grid_spec=pltpu.PrefetchScalarGridSpec(
            num_scalar_prefetch=0,
            grid=(B,),
            in_specs=in_specs,
            out_specs=pl.BlockSpec((1, S, D), lambda b: (b, 0, 0)),
        ),
        compiler_params=pltpu.CompilerParams(dimension_semantics=("parallel",)),
    )(x, *weights)


def run_fc(x, w, b, *, tile_v=512):
    """x: (B, S, D) bf16, w: (D, V) bf16, b: (1, V) f32 -> (B, S, V) f32.

    Tiled over the vocab dimension so the weight block always fits VMEM and
    the output last dim is a lane-dense multiple of 128.
    """
    B, S, D = x.shape
    V = w.shape[1]
    TV = min(tile_v, _round_up(V, 128))
    V_pad = _round_up(V, TV)
    if V_pad != V:
        w = jnp.pad(w, ((0, 0), (0, V_pad - V)))
        b = jnp.pad(b, ((0, 0), (0, V_pad - V)))
    n_vt = V_pad // TV

    out = pl.pallas_call(
        fc_kernel,
        out_shape=jax.ShapeDtypeStruct((B, S, V_pad), jnp.float32),
        grid_spec=pltpu.PrefetchScalarGridSpec(
            num_scalar_prefetch=0,
            grid=(B, n_vt),
            in_specs=[pl.BlockSpec((1, S, D), lambda bi, j: (bi, 0, 0)),
                      pl.BlockSpec((D, TV), lambda bi, j: (0, j)),
                      pl.BlockSpec((1, TV), lambda bi, j: (0, j))],
            out_specs=pl.BlockSpec((1, S, TV), lambda bi, j: (bi, 0, j)),
        ),
        compiler_params=pltpu.CompilerParams(
            dimension_semantics=("parallel", "parallel")),
    )(x, w, b)
    return out[:, :, :V]


# ----------------------------------------------------------------------------
# Model: parameters + forward
# ----------------------------------------------------------------------------

def make_positional_encoding(d_model, max_len=5000):
    position = jnp.arange(max_len, dtype=jnp.float32)[:, None]           # (L, 1)
    div_term = jnp.exp(jnp.arange(0, d_model, 2, dtype=jnp.float32)
                       * (-math.log(10000.0) / d_model))                 # (D/2,)
    pe = jnp.zeros((max_len, d_model), dtype=jnp.float32)
    pe = pe.at[:, 0::2].set(jnp.sin(position * div_term))
    pe = pe.at[:, 1::2].set(jnp.cos(position * div_term))
    return pe[:, None, :]                                                # (L, 1, D)


def init_params(key, vocab_size, d_model, nhead, num_layers, dim_feedforward):
    """Kernel-ready parameter layout.

    Attention weights are stored head-major:
      wq/wk/wv: (nhead, d_model, head_dim), wo: (nhead, head_dim, d_model).
    Porting trained PyTorch weights requires transposing/splitting
    in_proj_weight (3D, D) and out_proj.weight (D, D) accordingly.
    """
    hd = d_model // nhead
    keys = jax.random.split(key, 2 + num_layers)
    s = 0.02
    bf16 = jnp.bfloat16

    params = {}
    params["embedding"] = (
        jax.random.normal(keys[0], (vocab_size, d_model), jnp.float32) * s)

    layers = []
    for l in range(num_layers):
        lk = jax.random.split(keys[1 + l], 6)
        wq = (jax.random.normal(lk[0], (nhead, d_model, hd), jnp.float32) * s).astype(bf16)
        wk = (jax.random.normal(lk[1], (nhead, d_model, hd), jnp.float32) * s).astype(bf16)
        wv = (jax.random.normal(lk[2], (nhead, d_model, hd), jnp.float32) * s).astype(bf16)
        bq = jnp.zeros((nhead, 1, hd), jnp.float32)
        bk = jnp.zeros((nhead, 1, hd), jnp.float32)
        bv = jnp.zeros((nhead, 1, hd), jnp.float32)
        wo = (jax.random.normal(lk[3], (nhead, hd, d_model), jnp.float32) * s).astype(bf16)
        bo = jnp.zeros((1, d_model), jnp.float32)
        ln1w = jnp.ones((1, d_model), jnp.float32)
        ln1b = jnp.zeros((1, d_model), jnp.float32)
        w1 = (jax.random.normal(lk[4], (d_model, dim_feedforward), jnp.float32) * s).astype(bf16)
        b1 = jnp.zeros((1, dim_feedforward), jnp.float32)
        w2 = (jax.random.normal(lk[5], (dim_feedforward, d_model), jnp.float32) * s).astype(bf16)
        b2 = jnp.zeros((1, d_model), jnp.float32)
        ln2w = jnp.ones((1, d_model), jnp.float32)
        ln2b = jnp.zeros((1, d_model), jnp.float32)
        layers.append((wq, wk, wv, bq, bk, bv, wo, bo,
                       ln1w, ln1b, w1, b1, w2, b2, ln2w, ln2b))
    params["layers"] = layers

    params["fc_w"] = (
        jax.random.normal(keys[-1], (d_model, vocab_size), jnp.float32) * s).astype(bf16)
    params["fc_b"] = jnp.zeros((1, vocab_size), jnp.float32)
    params["pe"] = make_positional_encoding(d_model)
    return params


def transformer_forward(params, src_ids, nhead):
    """src_ids: (S, B) int32 token ids -> logits (S, B, vocab) f32."""
    S, B = src_ids.shape
    emb_table = params["embedding"]
    d_model = emb_table.shape[1]

    # Embedding lookup directly in batch-major layout + scale + pos. encoding.
    x = jnp.take(emb_table, src_ids.T, axis=0) * math.sqrt(d_model)   # (B, S, D) f32
    x = x + params["pe"][:S, 0, :][None]                              # broadcast over B
    # Dropout (p=0.1) is identity in eval mode.
    x = x.astype(jnp.bfloat16)

    for layer_params in params["layers"]:
        x = run_encoder_layer(x, layer_params, nhead)                 # (B, S, D) bf16

    logits = run_fc(x, params["fc_w"], params["fc_b"])                # (B, S, V) f32
    return jnp.transpose(logits, (1, 0, 2))                           # (S, B, V)


# ----------------------------------------------------------------------------
# Demo
# ----------------------------------------------------------------------------

if __name__ == "__main__":
    vocab_size = 50
    d_model = 32
    nhead = 4
    num_layers = 2
    dim_feedforward = 64
    seq_len = 8
    batch = 2

    key = jax.random.PRNGKey(0)
    pkey, dkey = jax.random.split(key)
    params = init_params(pkey, vocab_size, d_model, nhead, num_layers,
                         dim_feedforward)

    src = jax.random.randint(dkey, (seq_len, batch), 0, vocab_size,
                             dtype=jnp.int32)

    fwd = jax.jit(functools.partial(transformer_forward, nhead=nhead))
    out = fwd(params, src)
    out = jax.block_until_ready(out)

    assert out.shape == (seq_len, batch, vocab_size), out.shape
    assert jnp.all(jnp.isfinite(out))
    print("KERNEL_OK")
</pallas_src>

<mosaic_0001>
module attributes {stable_mosaic.version = 11 : i64} {
  func.func @fc_kernel(%arg0: i32, %arg1: i32, %arg2: memref<1x8x32xbf16, #tpu.memory_space<vmem>>, %arg3: memref<32x128xbf16, #tpu.memory_space<vmem>>, %arg4: memref<1x128xf32, #tpu.memory_space<vmem>>, %arg5: memref<1x8x128xf32, #tpu.memory_space<vmem>>) attributes {dimension_semantics = [#tpu.dimension_semantics<parallel>, #tpu.dimension_semantics<parallel>], iteration_bounds = array<i64: 2, 1>, scalar_prefetch = 0 : i64, scratch_operands = 0 : i64, tpu.core_type = #tpu.core_type<tc>, window_params = [{transform_indices = @transform_0, window_bounds = array<i64: 1, 8, 32>}, {transform_indices = @transform_1, window_bounds = array<i64: 32, 128>}, {transform_indices = @transform_2, window_bounds = array<i64: 1, 128>}, {transform_indices = @transform_3, window_bounds = array<i64: 1, 8, 128>}]} {
    %c0 = arith.constant 0 : index
    %c0_0 = arith.constant 0 : index
    %c0_1 = arith.constant 0 : index
    %0 = vector.load %arg2[%c0, %c0_0, %c0_1] : memref<1x8x32xbf16, #tpu.memory_space<vmem>>, vector<1x8x32xbf16>
    %1 = vector.shape_cast %0 : vector<1x8x32xbf16> to vector<8x32xbf16>
    %c0_2 = arith.constant 0 : index
    %c0_3 = arith.constant 0 : index
    %2 = vector.load %arg3[%c0_2, %c0_3] : memref<32x128xbf16, #tpu.memory_space<vmem>>, vector<32x128xbf16>
    %cst = arith.constant dense<0.000000e+00> : vector<8x128xf32>
    %3 = tpu.matmul %1, %2, %cst {dimension_numbers = #tpu.dot_dimension_numbers<[1], [0], [0], [1], [0, 0, 1, 1], [], []>} : vector<8x32xbf16>, vector<32x128xbf16>, vector<8x128xf32> -> vector<8x128xf32>
    %c0_4 = arith.constant 0 : index
    %c0_5 = arith.constant 0 : index
    %4 = vector.load %arg4[%c0_4, %c0_5] : memref<1x128xf32, #tpu.memory_space<vmem>>, vector<1x128xf32>
    %5 = vector.broadcast %4 : vector<1x128xf32> to vector<8x128xf32>
    %6 = arith.addf %3, %5 : vector<8x128xf32>
    %c0_6 = arith.constant 0 : index
    %c0_7 = arith.constant 0 : index
    %c0_8 = arith.constant 0 : index
    %7 = vector.load %arg5[%c0_6, %c0_7, %c0_8] : memref<1x8x128xf32, #tpu.memory_space<vmem>>, vector<1x8x128xf32>
    %8 = vector.shape_cast %7 : vector<1x8x128xf32> to vector<8x128xf32>
    %9 = vector.shape_cast %6 : vector<8x128xf32> to vector<1x8x128xf32>
    tpu.vector_store %arg5[%c0_6, %c0_7, %c0_8], %9 {strides = array<i32>} : memref<1x8x128xf32, #tpu.memory_space<vmem>>, vector<1x8x128xf32>,
    return
  }
  func.func @transform_0(%arg0: i32, %arg1: i32) -> (i32, i32, i32) {
    %c0_i32 = arith.constant 0 : i32
    %c0_i32_0 = arith.constant 0 : i32
    %c0_i32_1 = arith.constant 0 : i32
    return %arg0, %c0_i32, %c0_i32_0 : i32, i32, i32
  }
  func.func @transform_1(%arg0: i32, %arg1: i32) -> (i32, i32) {
    %c0_i32 = arith.constant 0 : i32
    %c0_i32_0 = arith.constant 0 : i32
    return %c0_i32, %arg1 : i32, i32
  }
  func.func @transform_2(%arg0: i32, %arg1: i32) -> (i32, i32) {
    %c0_i32 = arith.constant 0 : i32
    %c0_i32_0 = arith.constant 0 : i32
    return %c0_i32, %arg1 : i32, i32
  }
  func.func @transform_3(%arg0: i32, %arg1: i32) -> (i32, i32, i32) {
    %c0_i32 = arith.constant 0 : i32
    %c0_i32_0 = arith.constant 0 : i32
    return %arg0, %c0_i32, %arg1 : i32, i32, i32
  }
}

module attributes {stable_mosaic.version = 11 : i64} {
  func.func @encoder_layer_kernel(%arg0: i32, %arg1: memref<1x8x32xbf16, #tpu.memory_space<vmem>>, %arg2: memref<4x32x8xbf16, #tpu.memory_space<vmem>>, %arg3: memref<4x32x8xbf16, #tpu.memory_space<vmem>>, %arg4: memref<4x32x8xbf16, #tpu.memory_space<vmem>>, %arg5: memref<4x1x8xf32, #tpu.memory_space<vmem>>, %arg6: memref<4x1x8xf32, #tpu.memory_space<vmem>>, %arg7: memref<4x1x8xf32, #tpu.memory_space<vmem>>, %arg8: memref<4x8x32xbf16, #tpu.memory_space<vmem>>, %arg9: memref<1x32xf32, #tpu.memory_space<vmem>>, %arg10: memref<1x32xf32, #tpu.memory_space<vmem>>, %arg11: memref<1x32xf32, #tpu.memory_space<vmem>>, %arg12: memref<32x64xbf16, #tpu.memory_space<vmem>>, %arg13: memref<1x64xf32, #tpu.memory_space<vmem>>, %arg14: memref<64x32xbf16, #tpu.memory_space<vmem>>, %arg15: memref<1x32xf32, #tpu.memory_space<vmem>>, %arg16: memref<1x32xf32, #tpu.memory_space<vmem>>, %arg17: memref<1x32xf32, #tpu.memory_space<vmem>>, %arg18: memref<1x8x32xbf16, #tpu.memory_space<vmem>>) attributes {dimension_semantics = [#tpu.dimension_semantics<parallel>], iteration_bounds = array<i64: 2>, scalar_prefetch = 0 : i64, scratch_operands = 0 : i64, tpu.core_type = #tpu.core_type<tc>, window_params = [{transform_indices = @transform_0, window_bounds = array<i64: 1, 8, 32>}, {pipeline_mode = #tpu.pipeline_mode<synchronous>, transform_indices = @transform_1, window_bounds = array<i64: 4, 32, 8>}, {pipeline_mode = #tpu.pipeline_mode<synchronous>, transform_indices = @transform_2, window_bounds = array<i64: 4, 32, 8>}, {pipeline_mode = #tpu.pipeline_mode<synchronous>, transform_indices = @transform_3, window_bounds = array<i64: 4, 32, 8>}, {pipeline_mode = #tpu.pipeline_mode<synchronous>, transform_indices = @transform_4, window_bounds = array<i64: 4, 1, 8>}, {pipeline_mode = #tpu.pipeline_mode<synchronous>, transform_indices = @transform_5, window_bounds = array<i64: 4, 1, 8>}, {pipeline_mode = #tpu.pipeline_mode<synchronous>, transform_indices = @transform_6, window_bounds = array<i64: 4, 1, 8>}, {pipeline_mode = #tpu.pipeline_mode<synchronous>, transform_indices = @transform_7, window_bounds = array<i64: 4, 8, 32>}, {pipeline_mode = #tpu.pipeline_mode<synchronous>, transform_indices = @transform_8, window_bounds = array<i64: 1, 32>}, {pipeline_mode = #tpu.pipeline_mode<synchronous>, transform_indices = @transform_9, window_bounds = array<i64: 1, 32>}, {pipeline_mode = #tpu.pipeline_mode<synchronous>, transform_indices = @transform_10, window_bounds = array<i64: 1, 32>}, {pipeline_mode = #tpu.pipeline_mode<synchronous>, transform_indices = @transform_11, window_bounds = array<i64: 32, 64>}, {pipeline_mode = #tpu.pipeline_mode<synchronous>, transform_indices = @transform_12, window_bounds = array<i64: 1, 64>}, {pipeline_mode = #tpu.pipeline_mode<synchronous>, transform_indices = @transform_13, window_bounds = array<i64: 64, 32>}, {pipeline_mode = #tpu.pipeline_mode<synchronous>, transform_indices = @transform_14, window_bounds = array<i64: 1, 32>}, {pipeline_mode = #tpu.pipeline_mode<synchronous>, transform_indices = @transform_15, window_bounds = array<i64: 1, 32>}, {pipeline_mode = #tpu.pipeline_mode<synchronous>, transform_indices = @transform_16, window_bounds = array<i64: 1, 32>}, {transform_indices = @transform_17, window_bounds = array<i64: 1, 8, 32>}]} {
    %c0 = arith.constant 0 : index
    %c0_0 = arith.constant 0 : index
    %c0_1 = arith.constant 0 : index
    %0 = vector.load %arg1[%c0, %c0_0, %c0_1] : memref<1x8x32xbf16, #tpu.memory_space<vmem>>, vector<1x8x32xbf16>
    %1 = vector.shape_cast %0 : vector<1x8x32xbf16> to vector<8x32xbf16>
    %2 = arith.extf %1 : vector<8x32xbf16> to vector<8x32xf32>
    %3 = vector.shape_cast %1 : vector<8x32xbf16> to vector<1x8x32xbf16>
    %4 = vector.shape_cast %3 : vector<1x8x32xbf16> to vector<1x8x32xbf16>
    %5 = vector.broadcast %4 : vector<1x8x32xbf16> to vector<4x8x32xbf16>
    %c0_2 = arith.constant 0 : index
    %c0_3 = arith.constant 0 : index
    %c0_4 = arith.constant 0 : index
    %6 = vector.load %arg2[%c0_2, %c0_3, %c0_4] : memref<4x32x8xbf16, #tpu.memory_space<vmem>>, vector<4x32x8xbf16>
    "tpu.trace_start"() <{level = 10 : i32, message = "hsd,hde->hse"}> : () -> ()
    %cst = arith.constant dense<0.000000e+00> : vector<4x8x8xf32>
    %7 = tpu.matmul %5, %6, %cst {dimension_numbers = #tpu.dot_dimension_numbers<[2], [1], [1], [2], [0, 0, 0, 1, 1, 2], [0], [0]>} : vector<4x8x32xbf16>, vector<4x32x8xbf16>, vector<4x8x8xf32> -> vector<4x8x8xf32>
    "tpu.trace_stop"() : () -> ()
    %c0_5 = arith.constant 0 : index
    %c0_6 = arith.constant 0 : index
    %c0_7 = arith.constant 0 : index
    %8 = vector.load %arg5[%c0_5, %c0_6, %c0_7] : memref<4x1x8xf32, #tpu.memory_space<vmem>>, vector<4x1x8xf32>
    %9 = vector.broadcast %8 : vector<4x1x8xf32> to vector<4x8x8xf32>
    %10 = arith.addf %7, %9 : vector<4x8x8xf32>
    %c0_8 = arith.constant 0 : index
    %c0_9 = arith.constant 0 : index
    %c0_10 = arith.constant 0 : index
    %11 = vector.load %arg3[%c0_8, %c0_9, %c0_10] : memref<4x32x8xbf16, #tpu.memory_space<vmem>>, vector<4x32x8xbf16>
    "tpu.trace_start"() <{level = 10 : i32, message = "hsd,hde->hse"}> : () -> ()
    %cst_11 = arith.constant dense<0.000000e+00> : vector<4x8x8xf32>
    %12 = tpu.matmul %5, %11, %cst_11 {dimension_numbers = #tpu.dot_dimension_numbers<[2], [1], [1], [2], [0, 0, 0, 1, 1, 2], [0], [0]>} : vector<4x8x32xbf16>, vector<4x32x8xbf16>, vector<4x8x8xf32> -> vector<4x8x8xf32>
    "tpu.trace_stop"() : () -> ()
    %c0_12 = arith.constant 0 : index
    %c0_13 = arith.constant 0 : index
    %c0_14 = arith.constant 0 : index
    %13 = vector.load %arg6[%c0_12, %c0_13, %c0_14] : memref<4x1x8xf32, #tpu.memory_space<vmem>>, vector<4x1x8xf32>
    %14 = vector.broadcast %13 : vector<4x1x8xf32> to vector<4x8x8xf32>
    %15 = arith.addf %12, %14 : vector<4x8x8xf32>
    %c0_15 = arith.constant 0 : index
    %c0_16 = arith.constant 0 : index
    %c0_17 = arith.constant 0 : index
    %16 = vector.load %arg4[%c0_15, %c0_16, %c0_17] : memref<4x32x8xbf16, #tpu.memory_space<vmem>>, vector<4x32x8xbf16>
    "tpu.trace_start"() <{level = 10 : i32, message = "hsd,hde->hse"}> : () -> ()
    %cst_18 = arith.constant dense<0.000000e+00> : vector<4x8x8xf32>
    %17 = tpu.matmul %5, %16, %cst_18 {dimension_numbers = #tpu.dot_dimension_numbers<[2], [1], [1], [2], [0, 0, 0, 1, 1, 2], [0], [0]>} : vector<4x8x32xbf16>, vector<4x32x8xbf16>, vector<4x8x8xf32> -> vector<4x8x8xf32>
    "tpu.trace_stop"() : () -> ()
    %c0_19 = arith.constant 0 : index
    %c0_20 = arith.constant 0 : index
    %c0_21 = arith.constant 0 : index
    %18 = vector.load %arg7[%c0_19, %c0_20, %c0_21] : memref<4x1x8xf32, #tpu.memory_space<vmem>>, vector<4x1x8xf32>
    %19 = vector.broadcast %18 : vector<4x1x8xf32> to vector<4x8x8xf32>
    %20 = arith.addf %17, %19 : vector<4x8x8xf32>
    %21 = arith.truncf %10 : vector<4x8x8xf32> to vector<4x8x8xbf16>
    %22 = arith.truncf %15 : vector<4x8x8xf32> to vector<4x8x8xbf16>
    "tpu.trace_start"() <{level = 10 : i32, message = "hqe,hke->hqk"}> : () -> ()
    %cst_22 = arith.constant dense<0.000000e+00> : vector<4x8x8xf32>
    %23 = tpu.matmul %21, %22, %cst_22 {dimension_numbers = #tpu.dot_dimension_numbers<[2], [2], [1], [1], [0, 0, 0, 1, 1, 1], [0], [0]>} : vector<4x8x8xbf16>, vector<4x8x8xbf16>, vector<4x8x8xf32> -> vector<4x8x8xf32>
    "tpu.trace_stop"() : () -> ()
    %cst_23 = arith.constant 0.353553385 : f32
    %24 = vector.broadcast %cst_23 : f32 to vector<4x8x8xf32>
    %25 = arith.mulf %23, %24 : vector<4x8x8xf32>
    %cst_24 = arith.constant dense<0xFF800000> : vector<4x8xf32>
    %26 = vector.multi_reduction <maximumf>, %25, %cst_24 [2] : vector<4x8x8xf32> to vector<4x8xf32>
    %27 = vector.shape_cast %26 : vector<4x8xf32> to vector<4x8x1xf32>
    %28 = vector.broadcast %27 : vector<4x8x1xf32> to vector<4x8x8xf32>
    %29 = arith.subf %25, %28 : vector<4x8x8xf32>
    %30 = math.exp %29 : vector<4x8x8xf32>
    %cst_25 = arith.constant dense<0.000000e+00> : vector<4x8xf32>
    %31 = vector.multi_reduction <add>, %30, %cst_25 [2] : vector<4x8x8xf32> to vector<4x8xf32>
    %32 = vector.shape_cast %31 : vector<4x8xf32> to vector<4x8x1xf32>
    %33 = tpu.reciprocal %32 {approx = true} : vector<4x8x1xf32> -> vector<4x8x1xf32>
    %34 = vector.broadcast %33 : vector<4x8x1xf32> to vector<4x8x8xf32>
    %35 = arith.mulf %30, %34 : vector<4x8x8xf32>
    %36 = arith.truncf %35 : vector<4x8x8xf32> to vector<4x8x8xbf16>
    %37 = arith.truncf %20 : vector<4x8x8xf32> to vector<4x8x8xbf16>
    "tpu.trace_start"() <{level = 10 : i32, message = "hqk,hke->hqe"}> : () -> ()
    %cst_26 = arith.constant dense<0.000000e+00> : vector<4x8x8xf32>
    %38 = tpu.matmul %36, %37, %cst_26 {dimension_numbers = #tpu.dot_dimension_numbers<[2], [1], [1], [2], [0, 0, 0, 1, 1, 2], [0], [0]>} : vector<4x8x8xbf16>, vector<4x8x8xbf16>, vector<4x8x8xf32> -> vector<4x8x8xf32>
    "tpu.trace_stop"() : () -> ()
    %39 = arith.truncf %38 : vector<4x8x8xf32> to vector<4x8x8xbf16>
    %c0_27 = arith.constant 0 : index
    %c0_28 = arith.constant 0 : index
    %c0_29 = arith.constant 0 : index
    %40 = vector.load %arg8[%c0_27, %c0_28, %c0_29] : memref<4x8x32xbf16, #tpu.memory_space<vmem>>, vector<4x8x32xbf16>
    "tpu.trace_start"() <{level = 10 : i32, message = "hse,hed->hsd"}> : () -> ()
    %cst_30 = arith.constant dense<0.000000e+00> : vector<4x8x32xf32>
    %41 = tpu.matmul %39, %40, %cst_30 {dimension_numbers = #tpu.dot_dimension_numbers<[2], [1], [1], [2], [0, 0, 0, 1, 1, 2], [0], [0]>} : vector<4x8x8xbf16>, vector<4x8x32xbf16>, vector<4x8x32xf32> -> vector<4x8x32xf32>
    "tpu.trace_stop"() : () -> ()
    %cst_31 = arith.constant dense<0.000000e+00> : vector<8x32xf32>
    %42 = vector.multi_reduction <add>, %41, %cst_31 [0] : vector<4x8x32xf32> to vector<8x32xf32>
    %c0_32 = arith.constant 0 : index
    %c0_33 = arith.constant 0 : index
    %43 = vector.load %arg9[%c0_32, %c0_33] : memref<1x32xf32, #tpu.memory_space<vmem>>, vector<1x32xf32>
    %44 = vector.broadcast %43 : vector<1x32xf32> to vector<8x32xf32>
    %45 = arith.addf %42, %44 : vector<8x32xf32>
    %46 = arith.addf %2, %45 : vector<8x32xf32>
    %c0_34 = arith.constant 0 : index
    %c0_35 = arith.constant 0 : index
    %47 = vector.load %arg10[%c0_34, %c0_35] : memref<1x32xf32, #tpu.memory_space<vmem>>, vector<1x32xf32>
    %c0_36 = arith.constant 0 : index
    %c0_37 = arith.constant 0 : index
    %48 = vector.load %arg11[%c0_36, %c0_37] : memref<1x32xf32, #tpu.memory_space<vmem>>, vector<1x32xf32>
    %cst_38 = arith.constant dense<0.000000e+00> : vector<8xf32>
    %49 = vector.multi_reduction <add>, %46, %cst_38 [1] : vector<8x32xf32> to vector<8xf32>
    %50 = vector.shape_cast %49 : vector<8xf32> to vector<8x1xf32>
    %cst_39 = arith.constant 3.200000e+01 : f32
    %51 = vector.broadcast %cst_39 : f32 to vector<8x1xf32>
    %52 = arith.divf %50, %51 : vector<8x1xf32>
    %53 = vector.broadcast %52 : vector<8x1xf32> to vector<8x32xf32>
    %54 = arith.subf %46, %53 : vector<8x32xf32>
    %55 = arith.mulf %54, %54 : vector<8x32xf32>
    %cst_40 = arith.constant dense<0.000000e+00> : vector<8xf32>
    %56 = vector.multi_reduction <add>, %55, %cst_40 [1] : vector<8x32xf32> to vector<8xf32>
    %57 = vector.shape_cast %56 : vector<8xf32> to vector<8x1xf32>
    %cst_41 = arith.constant 3.200000e+01 : f32
    %58 = vector.broadcast %cst_41 : f32 to vector<8x1xf32>
    %59 = arith.divf %57, %58 : vector<8x1xf32>
    %cst_42 = arith.constant 9.99999974E-6 : f32
    %60 = vector.broadcast %cst_42 : f32 to vector<8x1xf32>
    %61 = arith.addf %59, %60 : vector<8x1xf32>
    %62 = math.rsqrt %61 : vector<8x1xf32>
    %63 = vector.broadcast %62 : vector<8x1xf32> to vector<8x32xf32>
    %64 = arith.mulf %54, %63 : vector<8x32xf32>
    %65 = vector.broadcast %47 : vector<1x32xf32> to vector<8x32xf32>
    %66 = arith.mulf %64, %65 : vector<8x32xf32>
    %67 = vector.broadcast %48 : vector<1x32xf32> to vector<8x32xf32>
    %68 = arith.addf %66, %67 : vector<8x32xf32>
    %69 = arith.truncf %68 : vector<8x32xf32> to vector<8x32xbf16>
    %c0_43 = arith.constant 0 : index
    %c0_44 = arith.constant 0 : index
    %70 = vector.load %arg12[%c0_43, %c0_44] : memref<32x64xbf16, #tpu.memory_space<vmem>>, vector<32x64xbf16>
    %cst_45 = arith.constant dense<0.000000e+00> : vector<8x64xf32>
    %71 = tpu.matmul %69, %70, %cst_45 {dimension_numbers = #tpu.dot_dimension_numbers<[1], [0], [0], [1], [0, 0, 1, 1], [], []>} : vector<8x32xbf16>, vector<32x64xbf16>, vector<8x64xf32> -> vector<8x64xf32>
    %c0_46 = arith.constant 0 : index
    %c0_47 = arith.constant 0 : index
    %72 = vector.load %arg13[%c0_46, %c0_47] : memref<1x64xf32, #tpu.memory_space<vmem>>, vector<1x64xf32>
    %73 = vector.broadcast %72 : vector<1x64xf32> to vector<8x64xf32>
    %74 = arith.addf %71, %73 : vector<8x64xf32>
    %cst_48 = arith.constant 0.000000e+00 : f32
    %75 = vector.broadcast %cst_48 : f32 to vector<8x64xf32>
    %76 = arith.maximumf %74, %75 : vector<8x64xf32>
    %77 = arith.truncf %76 : vector<8x64xf32> to vector<8x64xbf16>
    %c0_49 = arith.constant 0 : index
    %c0_50 = arith.constant 0 : index
    %78 = vector.load %arg14[%c0_49, %c0_50] : memref<64x32xbf16, #tpu.memory_space<vmem>>, vector<64x32xbf16>
    %cst_51 = arith.constant dense<0.000000e+00> : vector<8x32xf32>
    %79 = tpu.matmul %77, %78, %cst_51 {dimension_numbers = #tpu.dot_dimension_numbers<[1], [0], [0], [1], [0, 0, 1, 1], [], []>} : vector<8x64xbf16>, vector<64x32xbf16>, vector<8x32xf32> -> vector<8x32xf32>
    %c0_52 = arith.constant 0 : index
    %c0_53 = arith.constant 0 : index
    %80 = vector.load %arg15[%c0_52, %c0_53] : memref<1x32xf32, #tpu.memory_space<vmem>>, vector<1x32xf32>
    %81 = vector.broadcast %80 : vector<1x32xf32> to vector<8x32xf32>
    %82 = arith.addf %79, %81 : vector<8x32xf32>
    %83 = arith.addf %68, %82 : vector<8x32xf32>
    %c0_54 = arith.constant 0 : index
    %c0_55 = arith.constant 0 : index
    %84 = vector.load %arg16[%c0_54, %c0_55] : memref<1x32xf32, #tpu.memory_space<vmem>>, vector<1x32xf32>
    %c0_56 = arith.constant 0 : index
    %c0_57 = arith.constant 0 : index
    %85 = vector.load %arg17[%c0_56, %c0_57] : memref<1x32xf32, #tpu.memory_space<vmem>>, vector<1x32xf32>
    %cst_58 = arith.constant dense<0.000000e+00> : vector<8xf32>
    %86 = vector.multi_reduction <add>, %83, %cst_58 [1] : vector<8x32xf32> to vector<8xf32>
    %87 = vector.shape_cast %86 : vector<8xf32> to vector<8x1xf32>
    %cst_59 = arith.constant 3.200000e+01 : f32
    %88 = vector.broadcast %cst_59 : f32 to vector<8x1xf32>
    %89 = arith.divf %87, %88 : vector<8x1xf32>
    %90 = vector.broadcast %89 : vector<8x1xf32> to vector<8x32xf32>
    %91 = arith.subf %83, %90 : vector<8x32xf32>
    %92 = arith.mulf %91, %91 : vector<8x32xf32>
    %cst_60 = arith.constant dense<0.000000e+00> : vector<8xf32>
    %93 = vector.multi_reduction <add>, %92, %cst_60 [1] : vector<8x32xf32> to vector<8xf32>
    %94 = vector.shape_cast %93 : vector<8xf32> to vector<8x1xf32>
    %cst_61 = arith.constant 3.200000e+01 : f32
    %95 = vector.broadcast %cst_61 : f32 to vector<8x1xf32>
    %96 = arith.divf %94, %95 : vector<8x1xf32>
    %cst_62 = arith.constant 9.99999974E-6 : f32
    %97 = vector.broadcast %cst_62 : f32 to vector<8x1xf32>
    %98 = arith.addf %96, %97 : vector<8x1xf32>
    %99 = math.rsqrt %98 : vector<8x1xf32>
    %100 = vector.broadcast %99 : vector<8x1xf32> to vector<8x32xf32>
    %101 = arith.mulf %91, %100 : vector<8x32xf32>
    %102 = vector.broadcast %84 : vector<1x32xf32> to vector<8x32xf32>
    %103 = arith.mulf %101, %102 : vector<8x32xf32>
    %104 = vector.broadcast %85 : vector<1x32xf32> to vector<8x32xf32>
    %105 = arith.addf %103, %104 : vector<8x32xf32>
    %106 = arith.truncf %105 : vector<8x32xf32> to vector<8x32xbf16>
    %c0_63 = arith.constant 0 : index
    %c0_64 = arith.constant 0 : index
    %c0_65 = arith.constant 0 : index
    %107 = vector.load %arg18[%c0_63, %c0_64, %c0_65] : memref<1x8x32xbf16, #tpu.memory_space<vmem>>, vector<1x8x32xbf16>
    %108 = vector.shape_cast %107 : vector<1x8x32xbf16> to vector<8x32xbf16>
    %109 = vector.shape_cast %106 : vector<8x32xbf16> to vector<1x8x32xbf16>
    tpu.vector_store %arg18[%c0_63, %c0_64, %c0_65], %109 {strides = array<i32>} : memref<1x8x32xbf16, #tpu.memory_space<vmem>>, vector<1x8x32xbf16>,
    return
  }
  func.func @transform_0(%arg0: i32) -> (i32, i32, i32) {
    %c0_i32 = arith.constant 0 : i32
    %c0_i32_0 = arith.constant 0 : i32
    %c0_i32_1 = arith.constant 0 : i32
    return %arg0, %c0_i32, %c0_i32_0 : i32, i32, i32
  }
  func.func @transform_1(%arg0: i32) -> (i32, i32, i32) {
    %c0_i32 = arith.constant 0 : i32
    %c0_i32_0 = arith.constant 0 : i32
    %c0_i32_1 = arith.constant 0 : i32
    %c0_i32_2 = arith.constant 0 : i32
    return %c0_i32, %c0_i32_0, %c0_i32_1 : i32, i32, i32
  }
  func.func @transform_2(%arg0: i32) -> (i32, i32, i32) {
    %c0_i32 = arith.constant 0 : i32
    %c0_i32_0 = arith.constant 0 : i32
    %c0_i32_1 = arith.constant 0 : i32
    %c0_i32_2 = arith.constant 0 : i32
    return %c0_i32, %c0_i32_0, %c0_i32_1 : i32, i32, i32
  }
  func.func @transform_3(%arg0: i32) -> (i32, i32, i32) {
    %c0_i32 = arith.constant 0 : i32
    %c0_i32_0 = arith.constant 0 : i32
    %c0_i32_1 = arith.constant 0 : i32
    %c0_i32_2 = arith.constant 0 : i32
    return %c0_i32, %c0_i32_0, %c0_i32_1 : i32, i32, i32
  }
  func.func @transform_4(%arg0: i32) -> (i32, i32, i32) {
    %c0_i32 = arith.constant 0 : i32
    %c0_i32_0 = arith.constant 0 : i32
    %c0_i32_1 = arith.constant 0 : i32
    %c0_i32_2 = arith.constant 0 : i32
    return %c0_i32, %c0_i32_0, %c0_i32_1 : i32, i32, i32
  }
  func.func @transform_5(%arg0: i32) -> (i32, i32, i32) {
    %c0_i32 = arith.constant 0 : i32
    %c0_i32_0 = arith.constant 0 : i32
    %c0_i32_1 = arith.constant 0 : i32
    %c0_i32_2 = arith.constant 0 : i32
    return %c0_i32, %c0_i32_0, %c0_i32_1 : i32, i32, i32
  }
  func.func @transform_6(%arg0: i32) -> (i32, i32, i32) {
    %c0_i32 = arith.constant 0 : i32
    %c0_i32_0 = arith.constant 0 : i32
    %c0_i32_1 = arith.constant 0 : i32
    %c0_i32_2 = arith.constant 0 : i32
    return %c0_i32, %c0_i32_0, %c0_i32_1 : i32, i32, i32
  }
  func.func @transform_7(%arg0: i32) -> (i32, i32, i32) {
    %c0_i32 = arith.constant 0 : i32
    %c0_i32_0 = arith.constant 0 : i32
    %c0_i32_1 = arith.constant 0 : i32
    %c0_i32_2 = arith.constant 0 : i32
    return %c0_i32, %c0_i32_0, %c0_i32_1 : i32, i32, i32
  }
  func.func @transform_8(%arg0: i32) -> (i32, i32) {
    %c0_i32 = arith.constant 0 : i32
    %c0_i32_0 = arith.constant 0 : i32
    %c0_i32_1 = arith.constant 0 : i32
    return %c0_i32, %c0_i32_0 : i32, i32
  }
  func.func @transform_9(%arg0: i32) -> (i32, i32) {
    %c0_i32 = arith.constant 0 : i32
    %c0_i32_0 = arith.constant 0 : i32
    %c0_i32_1 = arith.constant 0 : i32
    return %c0_i32, %c0_i32_0 : i32, i32
  }
  func.func @transform_10(%arg0: i32) -> (i32, i32) {
    %c0_i32 = arith.constant 0 : i32
    %c0_i32_0 = arith.constant 0 : i32
    %c0_i32_1 = arith.constant 0 : i32
    return %c0_i32, %c0_i32_0 : i32, i32
  }
  func.func @transform_11(%arg0: i32) -> (i32, i32) {
    %c0_i32 = arith.constant 0 : i32
    %c0_i32_0 = arith.constant 0 : i32
    %c0_i32_1 = arith.constant 0 : i32
    return %c0_i32, %c0_i32_0 : i32, i32
  }
  func.func @transform_12(%arg0: i32) -> (i32, i32) {
    %c0_i32 = arith.constant 0 : i32
    %c0_i32_0 = arith.constant 0 : i32
    %c0_i32_1 = arith.constant 0 : i32
    return %c0_i32, %c0_i32_0 : i32, i32
  }
  func.func @transform_13(%arg0: i32) -> (i32, i32) {
    %c0_i32 = arith.constant 0 : i32
    %c0_i32_0 = arith.constant 0 : i32
    %c0_i32_1 = arith.constant 0 : i32
    return %c0_i32, %c0_i32_0 : i32, i32
  }
  func.func @transform_14(%arg0: i32) -> (i32, i32) {
    %c0_i32 = arith.constant 0 : i32
    %c0_i32_0 = arith.constant 0 : i32
    %c0_i32_1 = arith.constant 0 : i32
    return %c0_i32, %c0_i32_0 : i32, i32
  }
  func.func @transform_15(%arg0: i32) -> (i32, i32) {
    %c0_i32 = arith.constant 0 : i32
    %c0_i32_0 = arith.constant 0 : i32
    %c0_i32_1 = arith.constant 0 : i32
    return %c0_i32, %c0_i32_0 : i32, i32
  }
  func.func @transform_16(%arg0: i32) -> (i32, i32) {
    %c0_i32 = arith.constant 0 : i32
    %c0_i32_0 = arith.constant 0 : i32
    %c0_i32_1 = arith.constant 0 : i32
    return %c0_i32, %c0_i32_0 : i32, i32
  }
  func.func @transform_17(%arg0: i32) -> (i32, i32, i32) {
    %c0_i32 = arith.constant 0 : i32
    %c0_i32_0 = arith.constant 0 : i32
    %c0_i32_1 = arith.constant 0 : i32
    return %arg0, %c0_i32, %c0_i32_0 : i32, i32, i32
  }
}

</mosaic_0001>

<bundles_post_ra>
// kernel: transformer_forward.5
= control target key start
LH: loop header
LB: loop body
LE: loop exit
PB: predicated region body
PF: predicated region fallthrough
CT: control target
= control target key end

     0   :  { %s486_s12 = smov 0   ;;  %s488_s13 = smov 0   ;;  %s528_s0 = inlined_call_operand.vmem [shape: bf16[2,8,32], index: 0, kind: input, shape index: {}]   ;;  %s529_s1 = inlined_call_operand.vmem [shape: bf16[32,128], index: 1, kind: input, shape index: {}]   ;;  %s530_s2 = inlined_call_operand.vmem [shape: f32[1,128], index: 2, kind: input, shape index: {}]   ;;  %s531_s3 = inlined_call_operand.vmem [shape: f32[2,8,128], index: 3, kind: output, shape index: {}]  }
   0x1   :  { %s490_s14 = smov 0  }
   0x2 LB: > { %s25_s15 = sadd.s32 1, %s458_s13  ;;  %p392_p0 = scmp.ge.s32.totalorder %s462_s14, 1  ;;  %s462_s14 = sphi %s490_s14, %s13_s14   ;;  %s458_s13 = sphi %s488_s13, %s533_s13   ;;  %s454_s12 = sphi %s486_s12, %s532_s12  }
   0x3   : > { %p27_p1 = scmp.ge.s32.totalorder %s25_s15, 2  ;;  %p167_p2 = scmp.lt.s32.totalorder %s462_s14, 3 }
   0x5   : > { %s535_s15 = smov (%p27_p1, %s25_s15), 0  ;;  %p168_p3 = pnand %p392_p0, %p167_p2 }
   0x6   : > { %v438_v0 = vld [vmem:[%s529_s1] sm:$0xff] (!%p168_p3)   ;;  %v464_v1 = vmov (!%p168_p3), 0.0   ;;  %v439_v2 = vld [vmem:[%s529_s1 + $0x8] sm:$0xff] (!%p168_p3)   ;;  %vm465_vm0 = vmmov (!%p168_p3), 0   ;;  %p199_p4 = scmp.lt.s32.totalorder (!%p168_p3), %s454_s12, 1  ;;  %vm242_vm1 = vcmask (!%p168_p3), 261120  }
   0x7   : > { %171 = sbr.rel (%p168_p3) target bundleno = 233 (0xe9), region = 32  ;;  %404 = vmatprep.subr.bf16.mxu0 (!%p168_p3), %v464_v1  ;;  %408 = vmatprep.mubr.msk.bf16.mxu0 (!%p168_p3), %vm465_vm0, %v464_v1  ;;  %v395_v4 = vld [vmem:[%s530_s2] ss:$0 sm:$0xff] (!%p168_p3) }
   0x8   : > { %405 = vmatpush3.bf16.msra.mxu0 (!%p168_p3), %v438_v0 }
   0x9   : > { %406 = vmatprep.subr.bf16.mxu0 (!%p168_p3), %v464_v1 }
   0xc   : > { %407 = vmatpush3.bf16.msra.mxu0 (!%p168_p3), %v439_v2 }
   0xe   : > { %s537_s12 = smov (!%p199_p4, %s454_s12), 1 }
   0xf   : > { %s393_s20 = sshll.u32 %s537_s12, 2  ;;  %s394_s24 = sshll.u32 %s537_s12, 3 }
  0x10   : > { %s202_s23 = scalar_lea.vmem %s528_s0, %s393_s20  ;;  %s216_s29 = scalar_lea.vmem %s531_s3, %s394_s24 }
  0x11   : > { %v218_v3 = vld [vmem:[%s202_s23] sm:$0xf] }
  0x12   : > { %409 = vmatmul.mubr.msk.bf16.vlgmr.msra.gmra.mrb[0].mxu0 %vm242_vm1, %v218_v3 }
  0xe5   : > { %v280_v5 = vpop.f32.mrb[0].mxu0 }
  0xe6   : > { %v281_v6 = vadd.f32 %v395_v4, %v280_v5  ;;  %v410_v7 = vpop.f32.mrb[1].mxu0 }
  0xe7   : > { %v283_v8 = vpop.f32.mrb[2].mxu0 }
  0xe8   : > { %286 = vst [vmem:[%s216_s29] sm:$0xff] %v281_v6  ;;  %v411_v9 = vpop.f32.mrb[3].mxu0 }
  0xe9 PF: > { %s13_s14 = sadd.s32 1, %s462_s14   ;;  %s532_s12 = smov %s458_s13 }
  0xea   : > { %p10_p5 = scmp.ge.s32.totalorder %s13_s14, 4   ;;  %s533_s13 = smov %s535_s15 }
  0xec   :  { %12 = sbr.rel (!%p10_p5) target bundleno = 2 (0x2), region = 68 }

// kernel: transformer_forward.3
= control target key start
LH: loop header
LB: loop body
LE: loop exit
PB: predicated region body
PF: predicated region fallthrough
CT: control target
= control target key end

     0   :  { %s2717_s24 = smov 0   ;;  %s3068_s0 = inlined_call_operand.vmem [shape: bf16[2,8,32], index: 0, kind: input, shape index: {}]   ;;  %s3069_s1 = inlined_call_operand.vmem [shape: bf16[4,32,8], index: 1, kind: input, shape index: {}]   ;;  %s3070_s2 = inlined_call_operand.vmem [shape: bf16[4,32,8], index: 2, kind: input, shape index: {}]   ;;  %s3071_s3 = inlined_call_operand.vmem [shape: bf16[4,32,8], index: 3, kind: input, shape index: {}]   ;;  %s3072_s4 = inlined_call_operand.vmem [shape: f32[4,1,8], index: 4, kind: input, shape index: {}]   ;;  %s3073_s5 = inlined_call_operand.vmem [shape: f32[4,1,8], index: 5, kind: input, shape index: {}]   ;;  %s3074_s6 = inlined_call_operand.vmem [shape: f32[4,1,8], index: 6, kind: input, shape index: {}]   ;;  %s3075_s7 = inlined_call_operand.vmem [shape: bf16[4,8,32], index: 7, kind: input, shape index: {}]   ;;  %s3076_s8 = inlined_call_operand.vmem [shape: f32[1,32], index: 8, kind: input, shape index: {}]   ;;  %s3077_s9 = inlined_call_operand.vmem [shape: f32[1,32], index: 9, kind: input, shape index: {}]   ;;  %s3078_s10 = inlined_call_operand.vmem [shape: f32[1,32], index: 10, kind: input, shape index: {}]   ;;  %s3079_s11 = inlined_call_operand.vmem [shape: bf16[32,64], index: 11, kind: input, shape index: {}]   ;;  %s3080_s12 = inlined_call_operand.vmem [shape: f32[1,64], index: 12, kind: input, shape index: {}]   ;;  %s3081_s13 = inlined_call_operand.vmem [shape: bf16[64,32], index: 13, kind: input, shape index: {}]   ;;  %s3082_s14 = inlined_call_operand.vmem [shape: f32[1,32], index: 14, kind: input, shape index: {}]   ;;  %s3083_s15 = inlined_call_operand.vmem [shape: f32[1,32], index: 15, kind: input, shape index: {}]   ;;  %s3084_s16 = inlined_call_operand.vmem [shape: f32[1,32], index: 16, kind: input, shape index: {}]   ;;  %s3085_s17 = inlined_call_operand.vmem [shape: bf16[2,8,32], index: 17, kind: output, shape index: {}]  }
   0x1   :  { %3087 = sst [smem:[#allocation2_spill]] %s3068_s0 }
   0x2   :  { %3088 = sst [smem:[#allocation3_spill]] %s3069_s1 }
   0x3 LB: > { %s2217_s25 = sadd.s32 4294967295, %s2623_s24   ;;  %p2221_p0 = scmp.ge.s32.totalorder %s2623_s24, 1  ;;  %s2623_s24 = sphi %s2717_s24, %s27_s24  }
   0x4   : > { %p486_p1 = scmp.lt.s32.totalorder %s2623_s24, 3 }
   0x6   : > { %p487_p2 = pnand %p2221_p0, %p486_p1 }
   0x7   : > { %s3089_s28 = sld [smem:[#allocation3_spill]] (!%p487_p2)  ;;  %v2625_v1 = vmov (!%p487_p2), 0.0   ;;  %vm2626_vm0 = vmmov (!%p487_p2), 0   ;;  %p536_p3 = scmp.lt.s32.totalorder (!%p487_p2), %s2217_s25, 1  ;;  %vm603_vm1 = vcmask (!%p487_p2), 261120   ;;  %v2575_v10 = vld [vmem:[%s3070_s2] sm:$0xff] (!%p487_p2)  }
   0x8   : > { %490 = sbr.rel (%p487_p2) target bundleno = 2301 (0x8fd), region = 88  ;;  %2369 = vmatprep.subr.bf16.mxu0 (!%p487_p2), %v2625_v1  ;;  %2377 = vmatprep.subr.bf16.mxu1 (!%p487_p2), %v2625_v1  ;;  %s3090_s27 = sld [smem:[#allocation2_spill]] (!%p487_p2)  ;;  %v2576_v11 = vld [vmem:[%s3070_s2 + $0x10] sm:$0xff] (!%p487_p2)   ;;  %v2577_v12 = vld [vmem:[%s3070_s2 + $0x8] sm:$0xff] (!%p487_p2)   ;;  %v2578_v13 = vld [vmem:[%s3070_s2 + $0x18] sm:$0xff] (!%p487_p2)   ;;  %vm1315_vm2 = vcmask (!%p487_p2), 64512  }
   0x9   : > { %2373 = vmatprep.mubr.msk.bf16.mxu0 (!%p487_p2), %vm2626_vm0, %v2625_v1  ;;  %2381 = vmatprep.mubr.msk.bf16.mxu1 (!%p487_p2), %vm2626_vm0, %v2625_v1  ;;  %v2579_v14 = vld [vmem:[%s3070_s2 + $0x20] sm:$0xff] (!%p487_p2)   ;;  %v2580_v15 = vld [vmem:[%s3070_s2 + $0x30] sm:$0xff] (!%p487_p2)   ;;  %v2581_v16 = vld [vmem:[%s3070_s2 + $0x28] sm:$0xff] (!%p487_p2)   ;;  %vm1559_vm3 = vcmask (!%p487_p2), 1043456   ;;  %vm2087_vm4 = vcmask (!%p487_p2), 523264   ;;  %vm2162_vm5 = vcmask (!%p487_p2), 257024  }
   0xa   : > { %v2582_v17 = vld [vmem:[%s3070_s2 + $0x38] sm:$0xff] (!%p487_p2)   ;;  %v2583_v18 = vld [vmem:[%s3071_s3] sm:$0xff] (!%p487_p2)   ;;  %v2584_v19 = vld [vmem:[%s3071_s3 + $0x10] sm:$0xff] (!%p487_p2)  }
   0xb   : > { %v2585_v20 = vld [vmem:[%s3071_s3 + $0x8] sm:$0xff] (!%p487_p2)   ;;  %v2586_v21 = vld [vmem:[%s3071_s3 + $0x18] sm:$0xff] (!%p487_p2)   ;;  %v2587_v22 = vld [vmem:[%s3071_s3 + $0x20] sm:$0xff] (!%p487_p2)  }
   0xc   : > { %v2588_v23 = vld [vmem:[%s3071_s3 + $0x30] sm:$0xff] (!%p487_p2)   ;;  %v2589_v24 = vld [vmem:[%s3071_s3 + $0x28] sm:$0xff] (!%p487_p2)   ;;  %v2590_v25 = vld [vmem:[%s3071_s3 + $0x38] sm:$0xff] (!%p487_p2)  }
   0xd   : > { %v2567_v0 = vld [vmem:[%s3089_s28] sm:$0xff] (!%p487_p2)   ;;  %v2568_v2 = vld [vmem:[%s3089_s28 + $0x10] sm:$0xff] (!%p487_p2)   ;;  %v2569_v3 = vld [vmem:[%s3089_s28 + $0x8] sm:$0xff] (!%p487_p2)  }
   0xe   : > { %2370 = vmatpush3.bf16.msra.mxu0 (!%p487_p2), %v2567_v0  ;;  %2378 = vmatpush3.bf16.msra.mxu1 (!%p487_p2), %v2568_v2  ;;  %v2570_v4 = vld [vmem:[%s3089_s28 + $0x18] sm:$0xff] (!%p487_p2)   ;;  %v2571_v5 = vld [vmem:[%s3089_s28 + $0x20] sm:$0xff] (!%p487_p2)   ;;  %v2572_v6 = vld [vmem:[%s3089_s28 + $0x30] sm:$0xff] (!%p487_p2)  }
   0xf   : > { %2371 = vmatprep.subr.bf16.mxu0 %v2625_v1  ;;  %2379 = vmatprep.subr.bf16.mxu1 %v2625_v1  ;;  %s3092_s25 = smov (!%p536_p3, %s2217_s25), 1  ;;  %v2573_v8 = vld [vmem:[%s3089_s28 + $0x28] sm:$0xff]   ;;  %v2574_v9 = vld [vmem:[%s3089_s28 + $0x38] sm:$0xff]   ;;  %v2240_v42 = vld [vmem:[%s3073_s5] ss:$0 sm:$0xff] }
  0x10   : > { %s2222_s20 = sshll.u32 %s3092_s25, 2  ;;  %v2241_v43 = vld [vmem:[%s3073_s5 + $0x1] ss:$0 sm:$0xff]  ;;  %v2224_v54 = vld [vmem:[%s3072_s4] ss:$0 sm:$0xff] }
  0x11   : > { %s539_s29 = scalar_lea.vmem %s3090_s27, %s2222_s20  ;;  %v2225_v57 = vld [vmem:[%s3072_s4 + $0x1] ss:$0 sm:$0xff]  ;;  %v2242_v60 = vld [vmem:[%s3073_s5 + $0x2] ss:$0 sm:$0xff]  ;;  %v2243_v62 = vld [vmem:[%s3073_s5 + $0x3] ss:$0 sm:$0xff] }
  0x12   : > { %2372 = vmatpush3.bf16.msra.mxu0 %v2569_v3  ;;  %2380 = vmatpush3.bf16.msra.mxu1 %v2570_v4  ;;  %v2760_v7 = vld [vmem:[%s539_s29] sm:$0xf]  ;;  %s543_s29 = scalar_lea.vmem %s3085_s17, %s2222_s20 }
  0x13   : > { %2385 = vmatprep.subr.bf16.mxu0 %v2625_v1  ;;  %2393 = vmatprep.subr.bf16.mxu1 %v2625_v1 }
  0x15   : > { %2374 = vmatmul.mubr.msk.bf16.vlgmr.msra.gmra.mrb[0].mxu0 %vm603_vm1, %v2760_v7  ;;  %2382 = vmatmul.mubr.msk.bf16.vlgmr.msra.gmra.mrb[0].mxu1 %vm603_vm1, %v2760_v7 }
  0x16   : > { %2386 = vmatpush3.bf16.msra.mxu0 %v2571_v5  ;;  %2394 = vmatpush3.bf16.msra.mxu1 %v2572_v6 }
  0x17   : > { %2387 = vmatprep.subr.bf16.mxu0 %v2625_v1  ;;  %2395 = vmatprep.subr.bf16.mxu1 %v2625_v1 }
  0x18   : > { %2389 = vmatprep.mubr.msk.bf16.mxu0 %vm2626_vm0, %v2625_v1  ;;  %2397 = vmatprep.mubr.msk.bf16.mxu1 %vm2626_vm0, %v2625_v1 }
  0x1a   : > { %2388 = vmatpush3.bf16.msra.mxu0 %v2573_v8  ;;  %2396 = vmatpush3.bf16.msra.mxu1 %v2574_v9 }
  0x1b   : > { %2401 = vmatprep.subr.bf16.mxu0 %v2625_v1  ;;  %2409 = vmatprep.subr.bf16.mxu1 %v2625_v1 }
  0x1d   : > { %2390 = vmatmul.mubr.msk.bf16.vlgmr.msra.gmra.mrb[4].mxu0 %vm603_vm1, %v2760_v7  ;;  %2398 = vmatmul.mubr.msk.bf16.vlgmr.msra.gmra.mrb[4].mxu1 %vm603_vm1, %v2760_v7 }
  0x1e   : > { %2402 = vmatpush3.bf16.msra.mxu0 %v2575_v10  ;;  %2410 = vmatpush3.bf16.msra.mxu1 %v2576_v11 }
  0x1f   : > { %2403 = vmatprep.subr.bf16.mxu0 %v2625_v1  ;;  %2411 = vmatprep.subr.bf16.mxu1 %v2625_v1 }
  0x20   : > { %2405 = vmatprep.mubr.msk.bf16.mxu0 %vm2626_vm0, %v2625_v1  ;;  %2413 = vmatprep.mubr.msk.bf16.mxu1 %vm2626_vm0, %v2625_v1 }
  0x22   : > { %2404 = vmatpush3.bf16.msra.mxu0 %v2577_v12  ;;  %2412 = vmatpush3.bf16.msra.mxu1 %v2578_v13 }
  0x23   : > { %2417 = vmatprep.subr.bf16.mxu0 %v2625_v1  ;;  %2425 = vmatprep.subr.bf16.mxu1 %v2625_v1 }
  0x25   : > { %2406 = vmatmul.mubr.msk.bf16.vlgmr.msra.gmra.mrb[8].mxu0 %vm603_vm1, %v2760_v7  ;;  %2414 = vmatmul.mubr.msk.bf16.vlgmr.msra.gmra.mrb[8].mxu1 %vm603_vm1, %v2760_v7 }
  0x26   : > { %2418 = vmatpush3.bf16.msra.mxu0 %v2579_v14  ;;  %2426 = vmatpush3.bf16.msra.mxu1 %v2580_v15  ;;  %v2226_v14 = vld [vmem:[%s3072_s4 + $0x2] ss:$0 sm:$0xff] }
  0x27   : > { %2419 = vmatprep.subr.bf16.mxu0 %v2625_v1  ;;  %2427 = vmatprep.subr.bf16.mxu1 %v2625_v1 }
  0x28   : > { %2421 = vmatprep.mubr.msk.bf16.mxu0 %vm2626_vm0, %v2625_v1  ;;  %2429 = vmatprep.mubr.msk.bf16.mxu1 %vm2626_vm0, %v2625_v1 }
  0x2a   : > { %2420 = vmatpush3.bf16.msra.mxu0 %v2581_v16  ;;  %2428 = vmatpush3.bf16.msra.mxu1 %v2582_v17  ;;  %v2227_v17 = vld [vmem:[%s3072_s4 + $0x3] ss:$0 sm:$0xff] }
  0x2b   : > { %2433 = vmatprep.subr.bf16.mxu0 %v2625_v1  ;;  %2441 = vmatprep.subr.bf16.mxu1 %v2625_v1 }
  0x2d   : > { %2422 = vmatmul.mubr.msk.bf16.vlgmr.msra.gmra.mrb[12].mxu0 %vm603_vm1, %v2760_v7  ;;  %2430 = vmatmul.mubr.msk.bf16.vlgmr.msra.gmra.mrb[12].mxu1 %vm603_vm1, %v2760_v7 }
  0x2e   : > { %2434 = vmatpush3.bf16.msra.mxu0 %v2583_v18  ;;  %2437 = vmatprep.mubr.msk.bf16.mxu0 %vm2626_vm0, %v2625_v1 }
  0x2f   : > { %2435 = vmatprep.subr.bf16.mxu0 %v2625_v1  ;;  %2445 = vmatprep.mubr.msk.bf16.mxu1 %vm2626_vm0, %v2625_v1 }
  0x30   : > { %2442 = vmatpush3.bf16.msra.mxu1 %v2584_v19 }
  0x31   : > { %2443 = vmatprep.subr.bf16.mxu1 %v2625_v1 }
  0x32   : > { %2436 = vmatpush3.bf16.msra.mxu0 %v2585_v20 }
  0x33   : > { %2449 = vmatprep.subr.bf16.mxu0 %v2625_v1 }
  0x34   : > { %2444 = vmatpush3.bf16.msra.mxu1 %v2586_v21 }
  0x35   : > { %2438 = vmatmul.mubr.msk.bf16.vlgmr.msra.gmra.mrb[16].mxu0 %vm603_vm1, %v2760_v7  ;;  %2457 = vmatprep.subr.bf16.mxu1 %v2625_v1 }
  0x36   : > { %2453 = vmatprep.mubr.msk.bf16.mxu0 %vm2626_vm0, %v2625_v1  ;;  %2450 = vmatpush3.bf16.msra.mxu0 %v2587_v22 }
  0x37   : > { %2446 = vmatmul.mubr.msk.bf16.vlgmr.msra.gmra.mrb[16].mxu1 %vm603_vm1, %v2760_v7  ;;  %2451 = vmatprep.subr.bf16.mxu0 %v2625_v1 }
  0x38   : > { %2458 = vmatpush3.bf16.msra.mxu1 %v2588_v23  ;;  %2461 = vmatprep.mubr.msk.bf16.mxu1 %vm2626_vm0, %v2625_v1 }
  0x39   : > { %2459 = vmatprep.subr.bf16.mxu1 %v2625_v1 }
  0x3a   : > { %2452 = vmatpush3.bf16.msra.mxu0 %v2589_v24  ;;  %v2256_v24 = vld [vmem:[%s3074_s6] ss:$0 sm:$0xff] }
  0x3b   : > { %2465 = vmatprep.subr.bf16.mxu0 %v2625_v1 }
  0x3c   : > { %2460 = vmatpush3.bf16.msra.mxu1 %v2590_v25 }
  0x3d   : > { %2471 = vmatprep.subr.bf16.mxu1 %v2625_v1  ;;  %2454 = vmatmul.mubr.msk.bf16.vlgmr.msra.gmra.mrb[20].mxu0 %vm603_vm1, %v2760_v7 }
  0x3e   : > { %2467 = vmatprep.mubr.msk.bf16.mxu0 %vm2626_vm0, %v2625_v1 }
  0x3f   : > { %2462 = vmatmul.mubr.msk.bf16.vlgmr.msra.gmra.mrb[20].mxu1 %vm603_vm1, %v2760_v7 }
  0x40   : > { %2473 = vmatprep.mubr.msk.bf16.mxu1 %vm2626_vm0, %v2625_v1 }
  0xe8   : > { %v641_v26 = vpop.f32.mrb[0].mxu0  ;;  %v693_v28 = vpop.f32.mrb[0].mxu1 }
  0xe9   : > { %v2375_v27 = vpop.f32.mrb[1].mxu0  ;;  %v2383_v30 = vpop.f32.mrb[1].mxu1  ;;  %v642_v61 = vadd.f32 %v2224_v54, %v641_v26  ;;  %v694_v63 = vadd.f32 %v2225_v57, %v693_v28  ;;  %v2257_v26 = vld [vmem:[%s3074_s6 + $0x1] ss:$0 sm:$0xff] }
  0xea   : > { %v644_v29 = vpop.f32.mrb[2].mxu0  ;;  %v696_v32 = vpop.f32.mrb[2].mxu1 }
  0xeb   : > { %v2376_v31 = vpop.f32.mrb[3].mxu0  ;;  %v2384_v33 = vpop.f32.mrb[3].mxu1  ;;  %v1307_v9 = vpack.c.bf16 %v642_v61, %v642_v61  ;;  %v1308_v13 = vpack.c.bf16 %v694_v63, %v694_v63 }
  0xf0   : > { %v745_v34 = vpop.f32.mrb[4].mxu0  ;;  %v797_v36 = vpop.f32.mrb[4].mxu1 }
  0xf1   : > { %v2391_v35 = vpop.f32.mrb[5].mxu0  ;;  %v2399_v38 = vpop.f32.mrb[5].mxu1  ;;  %v746_v20 = vadd.f32 %v2226_v14, %v745_v34  ;;  %v798_v21 = vadd.f32 %v2227_v17, %v797_v36 }
  0xf2   : > { %v748_v37 = vpop.f32.mrb[6].mxu0  ;;  %v800_v40 = vpop.f32.mrb[6].mxu1 }
  0xf3   : > { %v2392_v39 = vpop.f32.mrb[7].mxu0  ;;  %v2400_v41 = vpop.f32.mrb[7].mxu1  ;;  %v1309_v22 = vpack.c.bf16 %v746_v20, %v746_v20  ;;  %v1310_v23 = vpack.c.bf16 %v798_v21, %v798_v21 }
  0xf8   : > { %v893_v44 = vpop.f32.mrb[8].mxu0  ;;  %v945_v46 = vpop.f32.mrb[8].mxu1 }
  0xf9   : > { %v894_v45 = vadd.f32 %v2240_v42, %v893_v44  ;;  %v2407_v47 = vpop.f32.mrb[9].mxu0  ;;  %v946_v48 = vadd.f32 %v2241_v43, %v945_v46  ;;  %v2415_v50 = vpop.f32.mrb[9].mxu1 }
  0xfa   : > { %v896_v49 = vpop.f32.mrb[10].mxu0  ;;  %v948_v53 = vpop.f32.mrb[10].mxu1 }
  0xfb   : > { %v1311_v51 = vpack.c.bf16 %v894_v45, %v894_v45  ;;  %v2408_v52 = vpop.f32.mrb[11].mxu0  ;;  %v1312_v55 = vpack.c.bf16 %v946_v48, %v946_v48  ;;  %v2416_v56 = vpop.f32.mrb[11].mxu1 }
  0xfd   : > { %v1320_v58 = vsel %vm1315_vm2, %v1311_v51, 0  ;;  %v1366_v59 = vsel %vm1315_vm2, %v1312_v55, 0 }
  0xfe   : > { %2466 = vmatpush3.bf16.xpose.msra.mxu0 %v1320_v58  ;;  %2472 = vmatpush3.bf16.xpose.msra.mxu1 %v1366_v59 }
  0xff   : > { %2477 = vmatprep.subr.bf16.mxu0 %v2625_v1  ;;  %2483 = vmatprep.subr.bf16.mxu1 %v2625_v1 }
 0x100   : > { %v997_v0 = vpop.f32.mrb[12].mxu0  ;;  %v1049_v3 = vpop.f32.mrb[12].mxu1 }
 0x101   : > { %v998_v2 = vadd.f32 %v2242_v60, %v997_v0  ;;  %v2423_v4 = vpop.f32.mrb[13].mxu0  ;;  %v1050_v5 = vadd.f32 %v2243_v62, %v1049_v3  ;;  %v2431_v8 = vpop.f32.mrb[13].mxu1 }
 0x102   : > { %v1000_v6 = vpop.f32.mrb[14].mxu0  ;;  %v1052_v12 = vpop.f32.mrb[14].mxu1 }
 0x103   : > { %v1313_v10 = vpack.c.bf16 %v998_v2, %v998_v2  ;;  %v2424_v11 = vpop.f32.mrb[15].mxu0  ;;  %v1314_v15 = vpack.c.bf16 %v1050_v5, %v1050_v5  ;;  %v2432_v16 = vpop.f32.mrb[15].mxu1 }
 0x105   : > { %v1412_v18 = vsel %vm1315_vm2, %v1313_v10, 0  ;;  %2468 = vmatmul.mubr.msk.bf16.vlgmr.msra.gmra.mrb[24].mxu0 %vm1315_vm2, %v1307_v9  ;;  %v1458_v19 = vsel %vm1315_vm2, %v1314_v15, 0  ;;  %2474 = vmatmul.mubr.msk.bf16.vlgmr.msra.gmra.mrb[24].mxu1 %vm1315_vm2, %v1308_v13 }
 0x106   : > { %2478 = vmatpush3.bf16.xpose.msra.mxu0 %v1412_v18  ;;  %2484 = vmatpush3.bf16.xpose.msra.mxu1 %v1458_v19 }
 0x107   : > { %2479 = vmatprep.mubr.msk.bf16.mxu0 %vm2626_vm0, %v2625_v1  ;;  %2485 = vmatprep.mubr.msk.bf16.mxu1 %vm2626_vm0, %v2625_v1 }
 0x108   : > { %2489 = vmatprep.subr.bf16.mxu0 %v2625_v1  ;;  %2495 = vmatprep.subr.bf16.mxu1 %v2625_v1  ;;  %v1145_v25 = vpop.f32.mrb[16].mxu0 }
 0x109   : > { %v1146_v27 = vadd.f32 %v2256_v24, %v1145_v25  ;;  %v2439_v28 = vpop.f32.mrb[17].mxu0 }
 0x10a   : > { %v1148_v29 = vpop.f32.mrb[18].mxu0  ;;  %v1197_v30 = vpop.f32.mrb[16].mxu1 }
 0x10b   : > { %v1552_v31 = vpack.c.bf16 %v1146_v27, %v1146_v27  ;;  %v2440_v32 = vpop.f32.mrb[19].mxu0  ;;  %v1198_v33 = vadd.f32 %v2257_v26, %v1197_v30  ;;  %v2447_v34 = vpop.f32.mrb[17].mxu1 }
 0x10c   : > { %v1200_v35 = vpop.f32.mrb[18].mxu1  ;;  %v2258_v32 = vld [vmem:[%s3074_s6 + $0x2] ss:$0 sm:$0xff] }
 0x10d   : > { %2480 = vmatmul.mubr.msk.bf16.vlgmr.msra.gmra.mrb[28].mxu0 %vm1315_vm2, %v1309_v22  ;;  %2486 = vmatmul.mubr.msk.bf16.vlgmr.msra.gmra.mrb[28].mxu1 %vm1315_vm2, %v1310_v23  ;;  %v1561_v36 = vsel %vm1559_vm3, %v1552_v31, 0  ;;  %v1553_v37 = vpack.c.bf16 %v1198_v33, %v1198_v33  ;;  %v2448_v38 = vpop.f32.mrb[19].mxu1  ;;  %v2259_v35 = vld [vmem:[%s3074_s6 + $0x3] ss:$0 sm:$0xff] }
 0x10e   : > { %2491 = vmatprep.mubr.msk.bf16.mxu0 %vm2626_vm0, %v2625_v1  ;;  %2497 = vmatprep.mubr.msk.bf16.mxu1 %vm2626_vm0, %v2625_v1 }
 0x10f   : > { %2490 = vmatpush3.bf16.msra.mxu0 %v1561_v36  ;;  %v1607_v39 = vsel %vm1559_vm3, %v1553_v37, 0 }
 0x110   : > { %2501 = vmatprep.subr.bf16.mxu0 %v2625_v1  ;;  %2496 = vmatpush3.bf16.msra.mxu1 %v1607_v39  ;;  %v2939_v40 = vpop.f32.mrb[20].mxu0 }
 0x111   : > { %2507 = vmatprep.subr.bf16.mxu1 %v2625_v1  ;;  %v2455_v42 = vpop.f32.mrb[21].mxu0  ;;  %v1250_v33 = vadd.f32 %v2258_v32, %v2939_v40 }
 0x112   : > { %v2941_v41 = vpop.f32.mrb[20].mxu1  ;;  %v1252_v44 = vpop.f32.mrb[22].mxu0 }
 0x113   : > { %v2463_v43 = vpop.f32.mrb[21].mxu1  ;;  %v2456_v46 = vpop.f32.mrb[23].mxu0  ;;  %v1554_v37 = vpack.c.bf16 %v1250_v33, %v1250_v33  ;;  %v1302_v38 = vadd.f32 %v2259_v35, %v2941_v41  ;;  %v1745_v41 = vld [vmem:[%s3075_s7] sm:$0xf] }
 0x114   : > { %v1304_v45 = vpop.f32.mrb[22].mxu1 }
 0x115   : > { %v2464_v47 = vpop.f32.mrb[23].mxu1  ;;  %v1653_v45 = vsel %vm1559_vm3, %v1554_v37, 0  ;;  %v1555_v46 = vpack.c.bf16 %v1302_v38, %v1302_v38 }
 0x1d8   : > { %v1356_v48 = vpop.f32.mrb[24].mxu0  ;;  %v1402_v50 = vpop.f32.mrb[24].mxu1 }
 0x1d9   : > { %v1500_v49 = vmul.f32 0.35355338, %v1356_v48  ;;  %v2469_v51 = vpop.f32.mrb[25].mxu0  ;;  %v2475_v52 = vpop.f32.mrb[25].mxu1  ;;  %v1501_v54 = vmul.f32 0.35355338, %v1402_v50 }
 0x1da   : > { %v1359_v53 = vpop.f32.mrb[26].mxu0  ;;  %v1405_v55 = vpop.f32.mrb[26].mxu1  ;;  %v1753_v52 = vsel %vm1559_vm3, %v1745_v41, 0 }
 0x1db   : > { %v2470_v56 = vpop.f32.mrb[27].mxu0  ;;  %v1504_v57 = vsel %vm1315_vm2, %v1500_v49, -inf  ;;  %v2476_v58 = vpop.f32.mrb[27].mxu1  ;;  %v1507_v59 = vsel %vm1315_vm2, %v1501_v54, -inf }
 0x1dc   : > { %1505 = vmax.xlane.f32.xlu0 %v1504_v57  ;;  %v1746_v56 = vld [vmem:[%s3075_s7 + $0x4] sm:$0xf]  ;;  %v1747_v58 = vld [vmem:[%s3075_s7 + $0x8] sm:$0xf] }
 0x1dd   : > { %v1799_v57 = vsel %vm1559_vm3, %v1746_v56, 0 }
 0x1e0   : > { %1508 = vmax.xlane.f32.xlu0 %v1507_v59  ;;  %v1448_v60 = vpop.f32.mrb[28].mxu0  ;;  %v1494_v61 = vpop.f32.mrb[28].mxu1 }
 0x1e1   : > { %v1502_v62 = vmul.f32 0.35355338, %v1448_v60  ;;  %v2481_v63 = vpop.f32.mrb[29].mxu0  ;;  %v2487_v0 = vpop.f32.mrb[29].mxu1  ;;  %v1503_v3 = vmul.f32 0.35355338, %v1494_v61 }
 0x1e2   : > { %v1451_v2 = vpop.f32.mrb[30].mxu0  ;;  %v1497_v4 = vpop.f32.mrb[30].mxu1  ;;  %v1748_v0 = vld [vmem:[%s3075_s7 + $0xc] sm:$0xf] }
 0x1e3   : > { %v2482_v5 = vpop.f32.mrb[31].mxu0  ;;  %v1510_v6 = vsel %vm1315_vm2, %v1502_v62, -inf  ;;  %v2488_v8 = vpop.f32.mrb[31].mxu1  ;;  %v1513_v9 = vsel %vm1315_vm2, %v1503_v3, -inf }
 0x1e4   : > { %1511 = vmax.xlane.f32.xlu1 %v1510_v6  ;;  %v1891_v6 = vsel %vm1559_vm3, %v1748_v0, 0 }
 0x1e8   : > { %1514 = vmax.xlane.f32.xlu1 %v1513_v9 }
 0x269   : > { %v1506_v10 = vpop.xlane.xlu0 %1505 }
 0x26a   : > { %v1516_v11 = vsub.f32 %v1500_v49, %v1506_v10  ;;  %v1699_v49 = vsel %vm1559_vm3, %v1555_v46, 0 }
 0x26c   : > { %v1520_v12 = vmul.f32 1.442695, %v1516_v11 }
 0x26d   : > { %v1509_v13 = vpop.xlane.xlu0 %1508 }
 0x26e   : > { %2597 = vpow2.f32 %v1520_v12  ;;  %v1517_v14 = vsub.f32 %v1501_v54, %v1509_v13 }
 0x270   : > { %v1522_v15 = vmul.f32 1.442695, %v1517_v14 }
 0x271   : > { %v1512_v16 = vpop.xlane.xlu1 %1511 }
 0x272   : > { %2599 = vpow2.f32 %v1522_v15  ;;  %v1518_v17 = vsub.f32 %v1502_v62, %v1512_v16  ;;  %v1845_v62 = vsel %vm1559_vm3, %v1747_v58, 0 }
 0x274   : > { %v1524_v18 = vmul.f32 1.442695, %v1518_v17 }
 0x275   : > { %v1515_v19 = vpop.xlane.xlu1 %1514 }
 0x276   : > { %2601 = vpow2.f32 %v1524_v18  ;;  %v1519_v20 = vsub.f32 %v1503_v3, %v1515_v19 }
 0x278   : > { %v2598_v21 = vpop.eup %2597  ;;  %v1526_v22 = vmul.f32 1.442695, %v1519_v20 }
 0x279   : > { %v1528_v23 = vsel %vm1315_vm2, %v2598_v21, 0.0 }
 0x27a   : > { %2603 = vpow2.f32 %v1526_v22  ;;  %1529 = vadd.xlane.f32.xlu0 %v1528_v23 }
 0x27c   : > { %v2600_v24 = vpop.eup %2599 }
 0x27d   : > { %v1531_v25 = vsel %vm1315_vm2, %v2600_v24, 0.0 }
 0x27e   : > { %1532 = vadd.xlane.f32.xlu1 %v1531_v25 }
 0x280   : > { %v2602_v26 = vpop.eup %2601 }
 0x281   : > { %v1534_v27 = vsel %vm1315_vm2, %v2602_v26, 0.0 }
 0x282   : > { %1535 = vadd.xlane.f32.xlu0 %v1534_v27 }
 0x284   : > { %v2604_v28 = vpop.eup %2603 }
 0x285   : > { %v1537_v29 = vsel %vm1315_vm2, %v2604_v28, 0.0 }
 0x286   : > { %1538 = vadd.xlane.f32.xlu1 %v1537_v29 }
 0x307   : > { %v1530_v30 = vpop.xlane.xlu0 %1529 }
 0x308   : > { %2605 = vrcp.f32 %v1530_v30 }
 0x30b   : > { %v1533_v31 = vpop.xlane.xlu1 %1532 }
 0x30c   : > { %2607 = vrcp.f32 %v1533_v31 }
 0x30f   : > { %v1536_v34 = vpop.xlane.xlu0 %1535 }
 0x310   : > { %2609 = vrcp.f32 %v1536_v34 }
 0x312   : > { %v2606_v36 = vpop.eup %2605 }
 0x313   : > { %v1544_v39 = vmul.f32 %v2606_v36, %v2598_v21  ;;  %v1539_v42 = vpop.xlane.xlu1 %1538 }
 0x314   : > { %2611 = vrcp.f32 %v1539_v42 }
 0x315   : > { %v1548_v43 = vpack.c.bf16 %v1544_v39, %v1544_v39  ;;  %v2284_v39 = vld [vmem:[%s3076_s8] ss:$0 sm:$0xff] }
 0x316   : > { %v2608_v44 = vpop.eup %2607 }
 0x317   : > { %v1545_v47 = vmul.f32 %v2608_v44, %v2600_v24  ;;  %2492 = vmatmul.mubr.msk.bf16.vlgmr.msra.gmra.mrb[32].mxu0 %vm1315_vm2, %v1548_v43 }
 0x318   : > { %2502 = vmatpush3.bf16.msra.mxu0 %v1653_v45  ;;  %2503 = vmatprep.mubr.msk.bf16.mxu0 %vm2626_vm0, %v2625_v1  ;;  %v546_v45 = vunpack.c.l.bf16 %v2760_v7  ;;  %v2592_v7 = vld [vmem:[%s3079_s11 + $0x8] sm:$0xff]  }
 0x319   : > { %v1549_v40 = vpack.c.bf16 %v1545_v47, %v1545_v47  ;;  %2513 = vmatprep.subr.bf16.mxu0 %v2625_v1 }
 0x31a   : > { %v2610_v48 = vpop.eup %2609 }
 0x31b   : > { %v1546_v50 = vmul.f32 %v2610_v48, %v2602_v26  ;;  %2498 = vmatmul.mubr.msk.bf16.vlgmr.msra.gmra.mrb[32].mxu1 %vm1315_vm2, %v1549_v40 }
 0x31c   : > { %2508 = vmatpush3.bf16.msra.mxu1 %v1699_v49  ;;  %2509 = vmatprep.mubr.msk.bf16.mxu1 %vm2626_vm0, %v2625_v1 }
 0x31d   : > { %v1550_v51 = vpack.c.bf16 %v1546_v50, %v1546_v50  ;;  %2519 = vmatprep.subr.bf16.mxu1 %v2625_v1 }
 0x31e   : > { %v2612_v53 = vpop.eup %2611 }
 0x31f   : > { %v1547_v54 = vmul.f32 %v2612_v53, %v2604_v28  ;;  %2504 = vmatmul.mubr.msk.bf16.vlgmr.msra.gmra.mrb[36].mxu0 %vm1315_vm2, %v1550_v51  ;;  %v2591_v53 = vld [vmem:[%s3079_s11] sm:$0xff]  }
 0x320   : > { %2514 = vmatpush3.bf16.msra.mxu0 %v1753_v52  ;;  %2515 = vmatprep.mubr.msk.bf16.mxu0 %vm2626_vm0, %v2625_v1 }
 0x321   : > { %v1551_v55 = vpack.c.bf16 %v1547_v54, %v1547_v54  ;;  %2525 = vmatprep.subr.bf16.mxu0 %v2625_v1  ;;  %v2593_v54 = vld [vmem:[%s3081_s13] sm:$0xff]  }
 0x323   : > { %2510 = vmatmul.mubr.msk.bf16.vlgmr.msra.gmra.mrb[36].mxu1 %vm1315_vm2, %v1551_v55  ;;  %v2594_v55 = vld [vmem:[%s3081_s13 + $0x8] sm:$0xff]  }
 0x324   : > { %2521 = vmatprep.mubr.msk.bf16.mxu1 %vm2626_vm0, %v2625_v1  ;;  %2520 = vmatpush3.bf16.msra.mxu1 %v1799_v57 }
 0x325   : > { %2531 = vmatprep.subr.bf16.mxu1 %v2625_v1 }
 0x3ea   : > { %v1597_v59 = vpop.f32.mrb[32].mxu0 }
 0x3eb   : > { %v1741_v60 = vpack.c.bf16 %v1597_v59, %v1597_v59  ;;  %v2493_v61 = vpop.f32.mrb[33].mxu0 }
 0x3ec   : > { %v1600_v63 = vpop.f32.mrb[34].mxu0 }
 0x3ed   : > { %v2494_v2 = vpop.f32.mrb[35].mxu0  ;;  %2516 = vmatmul.mubr.msk.bf16.vlgmr.msra.gmra.mrb[40].mxu0 %vm1315_vm2, %v1741_v60  ;;  %v2285_v60 = vld [vmem:[%s3077_s9] ss:$0 sm:$0xff] }
 0x3ee   : > { %v1643_v3 = vpop.f32.mrb[32].mxu1  ;;  %2526 = vmatpush3.bf16.msra.mxu0 %v1845_v62  ;;  %2527 = vmatprep.mubr.msk.bf16.mxu0 %vm2626_vm0, %v2625_v1  ;;  %v2286_v62 = vld [vmem:[%s3078_s10] ss:$0 sm:$0xff] }
 0x3ef   : > { %v1742_v4 = vpack.c.bf16 %v1643_v3, %v1643_v3  ;;  %v2499_v5 = vpop.f32.mrb[33].mxu1  ;;  %2537 = vmatprep.subr.bf16.mxu0 %v2625_v1  ;;  %v2595_v3 = vld [vmem:[%s3081_s13 + $0x10] sm:$0xff]  }
 0x3f0   : > { %v1646_v8 = vpop.f32.mrb[34].mxu1  ;;  %v2287_v5 = vld [vmem:[%s3080_s12] ss:$0 sm:$0xff] }
 0x3f1   : > { %v2500_v9 = vpop.f32.mrb[35].mxu1  ;;  %2522 = vmatmul.mubr.msk.bf16.vlgmr.msra.gmra.mrb[40].mxu1 %vm1315_vm2, %v1742_v4  ;;  %v2596_v4 = vld [vmem:[%s3081_s13 + $0x18] sm:$0xff]  }
 0x3f2   : > { %v1689_v10 = vpop.f32.mrb[36].mxu0  ;;  %2532 = vmatpush3.bf16.msra.mxu1 %v1891_v6  ;;  %2533 = vmatprep.mubr.msk.bf16.mxu1 %vm2626_vm0, %v2625_v1 }
 0x3f3   : > { %v1743_v11 = vpack.c.bf16 %v1689_v10, %v1689_v10  ;;  %v2505_v12 = vpop.f32.mrb[37].mxu0  ;;  %2545 = vmatprep.subr.bf16.mxu1 %v2625_v1 }
 0x3f4   : > { %v1692_v13 = vpop.f32.mrb[38].mxu0 }
 0x3f5   : > { %v2506_v14 = vpop.f32.mrb[39].mxu0  ;;  %2528 = vmatmul.mubr.msk.bf16.vlgmr.msra.gmra.mrb[44].mxu0 %vm1315_vm2, %v1743_v11 }
 0x3f6   : > { %v1735_v15 = vpop.f32.mrb[36].mxu1  ;;  %2541 = vmatprep.mubr.msk.bf16.mxu0 %vm2626_vm0, %v2625_v1  ;;  %2538 = vmatpush3.bf16.msra.mxu0 %v2591_v53 }
 0x3f7   : > { %v1744_v16 = vpack.c.bf16 %v1735_v15, %v1735_v15  ;;  %v2511_v17 = vpop.f32.mrb[37].mxu1  ;;  %2539 = vmatprep.subr.bf16.mxu0 %v2625_v1 }
 0x3f8   : > { %v1738_v18 = vpop.f32.mrb[38].mxu1 }
 0x3f9   : > { %v2512_v19 = vpop.f32.mrb[39].mxu1  ;;  %2534 = vmatmul.mubr.msk.bf16.vlgmr.msra.gmra.mrb[44].mxu1 %vm1315_vm2, %v1744_v16 }
 0x3fa   : > { %2553 = vmatprep.mubr.msk.bf16.mxu1 %vm2626_vm0, %v2625_v1  ;;  %2540 = vmatpush3.bf16.msra.mxu0 %v2592_v7 }
 0x3fb   : > { %2546 = vmatpush3.bf16.msra.mxu1 %v2593_v54 }
 0x3fc   : > { %2547 = vmatprep.subr.bf16.mxu1 %v2625_v1 }
 0x3ff   : > { %2548 = vmatpush3.bf16.msra.mxu1 %v2594_v55 }
 0x400   : > { %2549 = vmatprep.subr.bf16.mxu1 %v2625_v1 }
 0x403   : > { %2550 = vmatpush3.bf16.msra.mxu1 %v2595_v3 }
 0x404   : > { %2551 = vmatprep.subr.bf16.mxu1 %v2625_v1  ;;  %v2291_v1 = vld [vmem:[%s3082_s14] ss:$0 sm:$0xff] }
 0x407   : > { %2552 = vmatpush3.bf16.msra.mxu1 %v2596_v4 }
 0x4c0   : > { %v1789_v20 = vpop.f32.mrb[40].mxu0 }
 0x4c1   : > { %v2517_v21 = vpop.f32.mrb[41].mxu0  ;;  %v1933_v25 = vsel %vm603_vm1, %v1789_v20, 0.0 }
 0x4c2   : > { %v1792_v22 = vpop.f32.mrb[42].mxu0 }
 0x4c3   : > { %v2518_v23 = vpop.f32.mrb[43].mxu0 }
 0x4c4   : > { %v1835_v24 = vpop.f32.mrb[40].mxu1 }
 0x4c5   : > { %v1934_v26 = vsel %vm603_vm1, %v1835_v24, 0.0  ;;  %v2523_v27 = vpop.f32.mrb[41].mxu1 }
 0x4c6   : > { %v1935_v28 = vadd.f32 %v1934_v26, %v1933_v25  ;;  %v1838_v29 = vpop.f32.mrb[42].mxu1 }
 0x4c7   : > { %v2524_v30 = vpop.f32.mrb[43].mxu1 }
 0x4c8   : > { %v1881_v31 = vpop.f32.mrb[44].mxu0  ;;  %v2297_v30 = vld [vmem:[%s3083_s15] ss:$0 sm:$0xff] }
 0x4c9   : > { %v1936_v32 = vsel %vm603_vm1, %v1881_v31, 0.0  ;;  %v2529_v33 = vpop.f32.mrb[45].mxu0 }
 0x4ca   : > { %v1937_v34 = vadd.f32 %v1936_v32, %v1935_v28  ;;  %v1884_v35 = vpop.f32.mrb[46].mxu0  ;;  %v2298_v32 = vld [vmem:[%s3084_s16] ss:$0 sm:$0xff] }
 0x4cb   : > { %v2530_v36 = vpop.f32.mrb[47].mxu0 }
 0x4cc   : > { %v1927_v37 = vpop.f32.mrb[44].mxu1 }
 0x4cd   : > { %v1938_v38 = vsel %vm603_vm1, %v1927_v37, 0.0  ;;  %v2535_v42 = vpop.f32.mrb[45].mxu1 }
 0x4ce   : > { %v1939_v43 = vadd.f32 %v1938_v38, %v1937_v34  ;;  %v1930_v44 = vpop.f32.mrb[46].mxu1 }
 0x4cf   : > { %v2536_v46 = vpop.f32.mrb[47].mxu1 }
 0x4d0   : > { %v1947_v47 = vadd.f32 %v2284_v39, %v1939_v43 }
 0x4d2   : > { %v1948_v40 = vadd.f32 %v1947_v47, %v546_v45 }
 0x4d4   : > { %v1951_v48 = vsel %vm603_vm1, %v1948_v40, 0.0 }
 0x4d5   : > { %1952 = vadd.xlane.f32.xlu0 %v1951_v48 }
 0x562   : > { %v1953_v41 = vpop.xlane.xlu0 %1952 }
 0x563   : > { %v1955_v49 = vmul.f32 0.03125, %v1953_v41 }
 0x565   : > { %v1956_v50 = vsub.f32 %v1948_v40, %v1955_v49 }
 0x567   : > { %v1957_v51 = vmul.f32 %v1956_v50, %v1956_v50 }
 0x569   : > { %v1958_v52 = vsel %vm603_vm1, %v1957_v51, 0.0 }
 0x56a   : > { %1959 = vadd.xlane.f32.xlu1 %v1958_v52 }
 0x5f7   : > { %v1960_v56 = vpop.xlane.xlu1 %1959 }
 0x5f8   : > { %v1961_v57 = vmul.f32 0.03125, %v1960_v56 }
 0x5fa   : > { %v1962_v58 = vadd.f32 1e-05, %v1961_v57 }
 0x5fc   : > { %2613 = vrsqrt.f32 %v1962_v58 }
 0x606   : > { %v2614_v59 = vpop.eup %2613 }
 0x607   : > { %v1964_v61 = vmul.f32 %v2614_v59, %v1956_v50 }
 0x609   : > { %v1971_v63 = vmul.f32 %v2285_v60, %v1964_v61 }
 0x60b   : > { %v1978_v0 = vadd.f32 %v2286_v62, %v1971_v63 }
 0x60d   : > { %v1979_v2 = vpack.c.bf16 %v1978_v0, %v1978_v0 }
 0x60f   : > { %2542 = vmatmul.mubr.msk.bf16.vlgmr.msra.gmra.mrb[48].mxu0 %vm603_vm1, %v1979_v2 }
 0x6e2   : > { %v2040_v6 = vpop.f32.mrb[48].mxu0 }
 0x6e3   : > { %v2041_v8 = vadd.f32 %v2287_v5, %v2040_v6  ;;  %v2543_v9 = vpop.f32.mrb[49].mxu0 }
 0x6e4   : > { %v2043_v10 = vpop.f32.mrb[50].mxu0 }
 0x6e5   : > { %v2046_v11 = vmax.f32 %v2041_v8, 0.0  ;;  %v2544_v12 = vpop.f32.mrb[51].mxu0 }
 0x6e7   : > { %v2047_v13 = vpack.c.bf16 %v2046_v11, %v2046_v11 }
 0x6e9   : > { %2554 = vmatmul.mubr.msk.bf16.vlgmr.msra.gmra.mrb[48].mxu1 %vm2087_vm4, %v2047_v13 }
 0x7bc   : > { %v2125_v14 = vpop.f32.mrb[48].mxu1 }
 0x7bd   : > { %v2126_v15 = vadd.f32 %v2291_v1, %v2125_v14  ;;  %v2555_v16 = vpop.f32.mrb[49].mxu1 }
 0x7be   : > { %v2128_v17 = vpop.f32.mrb[50].mxu1 }
 0x7bf   : > { %v2556_v18 = vpop.f32.mrb[51].mxu1  ;;  %v2131_v19 = vadd.f32 %v2126_v15, %v1978_v0 }
 0x7c1   : > { %v2134_v20 = vsel %vm603_vm1, %v2131_v19, 0.0 }
 0x7c2   : > { %2135 = vadd.xlane.f32.xlu0 %v2134_v20 }
 0x84f   : > { %v2136_v21 = vpop.xlane.xlu0 %2135 }
 0x850   : > { %v2137_v22 = vmul.f32 0.03125, %v2136_v21 }
 0x852   : > { %v2138_v23 = vsub.f32 %v2131_v19, %v2137_v22 }
 0x854   : > { %v2139_v24 = vmul.f32 %v2138_v23, %v2138_v23 }
 0x856   : > { %v2140_v25 = vsel %vm603_vm1, %v2139_v24, 0.0 }
 0x857   : > { %2141 = vadd.xlane.f32.xlu1 %v2140_v25 }
 0x8e4   : > { %v2142_v26 = vpop.xlane.xlu1 %2141 }
 0x8e5   : > { %v2143_v27 = vmul.f32 0.03125, %v2142_v26 }
 0x8e7   : > { %v2144_v28 = vadd.f32 1e-05, %v2143_v27 }
 0x8e9   : > { %2615 = vrsqrt.f32 %v2144_v28 }
 0x8f3   : > { %v2616_v29 = vpop.eup %2615 }
 0x8f4   : > { %v2146_v31 = vmul.f32 %v2616_v29, %v2138_v23 }
 0x8f6   : > { %v2153_v33 = vmul.f32 %v2297_v30, %v2146_v31 }
 0x8f8   : > { %v2160_v34 = vadd.f32 %v2298_v32, %v2153_v33 }
 0x8fa   : > { %v2161_v35 = vpack.c.bf16 %v2160_v34, %v2160_v34 }
 0x8fc   : > { %2163 = vst.msk [vmem:[%s543_s29] sm:$0xf] %vm2162_vm5, %v2161_v35 }
 0x8fd PF: > { %s27_s24 = sadd.s32 1, %s2623_s24  }
 0x8fe   : > { %p24_p4 = scmp.ge.s32.totalorder %s27_s24, 4  }
 0x900   :  { %26 = sbr.rel (!%p24_p4) target bundleno = 3 (0x3), region = 118 }

</bundles_post_ra>
